<compile_context>
chip_gen: v6e
topology: v6e:2x2x1
jax: 0.10.0
libtpu: 0.0.40
codegen_flags: <defaults>
</compile_context>

<pallas_src>
import jax
import jax.numpy as jnp
from jax.experimental import pallas as pl
from jax.experimental.pallas import tpu as pltpu  # noqa: F401  (TPU backend parity)

# Small shapes consistent with the module: seq=8, batch=2, d_model=32,
# nhead=4, dim_feedforward=64.
S, B, D, H, F = 8, 2, 32, 4, 64
DH = D // H
G = B * H                      # flattened (batch, head) groups
N = B * S                      # flattened rows
EPS = 1e-5
SCALE = 1.0 / (DH ** 0.5)

# Lane offsets inside the packed (D, 384) weight slab (128-aligned, no
# cross-lane-tile slicing in-kernel).
QKV_OFF, WO_OFF, W1_OFF = 0, 128, 256
# Row indices inside the packed (8, 128) per-channel vector slab.
_R_BQKV, _R_BO, _R_B1, _R_B2, _R_G1, _R_BE1, _R_G2, _R_BE2 = range(8)


def encoder_layer_kernel(x_ref, wA_ref, w2_ref, vec_ref, out_ref):
    x = x_ref[...]                                   # (N, D) = (16, 32)
    vecs = vec_ref[...]                              # (8, 128), exactly one vreg

    # ---- fused QKV projection: single (N,D)@(D,3D) MXU push (scale folded) ----
    qkv = jnp.dot(x, wA_ref[:, QKV_OFF:QKV_OFF + 3 * D],
                  preferred_element_type=jnp.float32) \
        + vecs[_R_BQKV:_R_BQKV + 1, 0:3 * D]         # (16, 96)

    # ---- restructure into per-(batch, head) groups for the batched core ----
    def heads(col0):
        blocks = [qkv[b * S:(b + 1) * S, col0 + h * DH:col0 + (h + 1) * DH][None]
                  for b in range(B) for h in range(H)]
        return jnp.concatenate(blocks, axis=0)       # (G, S, DH)
    q3, k3, v3 = heads(0), heads(D), heads(2 * D)

    # ---- batched attention core: contract last dims, no transposes ----
    s = jnp.einsum("gqd,gkd->gqk", q3, k3, preferred_element_type=jnp.float32)
    s = s - jnp.max(s, axis=-1, keepdims=True)
    p = jnp.exp(s)
    p = p * pl.reciprocal(jnp.sum(p, axis=-1, keepdims=True), approx=True)
    o3 = jnp.einsum("gqk,gkd->gqd", p, v3, preferred_element_type=jnp.float32)   # (G,S,DH)

    # ---- lane-concat heads back into a (N, D) slab; single out-proj matmul ----
    o2d = jnp.concatenate(
        [jnp.concatenate([o3[b * H + h] for h in range(H)], axis=-1)
         for b in range(B)], axis=0)                 # (16, 32) == concat_heads
    attn = jnp.dot(o2d, wA_ref[:, WO_OFF:WO_OFF + D],
                   preferred_element_type=jnp.float32) \
        + vecs[_R_BO:_R_BO + 1, 0:D]

    # residual (dropout1 == identity)
    src = x + attn

    # ---- BatchNorm1d #1: batch stats, centered variance, gamma folded in ----
    mean1 = jnp.mean(src, axis=0, keepdims=True)
    d1 = src - mean1
    var1 = jnp.mean(d1 * d1, axis=0, keepdims=True)
    src_n = d1 * (jax.lax.rsqrt(var1 + EPS) * vecs[_R_G1:_R_G1 + 1, 0:D]) \
        + vecs[_R_BE1:_R_BE1 + 1, 0:D]

    # ---- FFN: Linear -> ReLU -> Linear (dropouts == identity) ----
    h1 = jnp.dot(src_n, wA_ref[:, W1_OFF:W1_OFF + F],
                 preferred_element_type=jnp.float32) \
        + vecs[_R_B1:_R_B1 + 1, 0:F]
    h1 = jnp.maximum(h1, 0.0)
    ff = jnp.dot(h1, w2_ref[...], preferred_element_type=jnp.float32) \
        + vecs[_R_B2:_R_B2 + 1, 0:D]

    # residual (dropout2 == identity)
    src2 = src_n + ff

    # ---- BatchNorm1d #2 ----
    mean2 = jnp.mean(src2, axis=0, keepdims=True)
    d2 = src2 - mean2
    var2 = jnp.mean(d2 * d2, axis=0, keepdims=True)
    out_ref[...] = d2 * (jax.lax.rsqrt(var2 + EPS) * vecs[_R_G2:_R_G2 + 1, 0:D]) \
        + vecs[_R_BE2:_R_BE2 + 1, 0:D]


def _full_spec(shape):
    nd = len(shape)
    return pl.BlockSpec(shape, lambda *_: (0,) * nd)


def pack_params(p):
    """One-time wrapper-side packing: weight slab + W2 + packed vector slab."""
    # [Wq*scale | Wk | Wv] fused; Wo and W1 parked at 128-lane offsets.
    wqkv = jnp.concatenate([p["wq"] * SCALE, p["wk"], p["wv"]], axis=1)   # (D, 3D)
    wA = jnp.zeros((D, 3 * 128), jnp.float32)
    wA = wA.at[:, QKV_OFF:QKV_OFF + 3 * D].set(wqkv)
    wA = wA.at[:, WO_OFF:WO_OFF + D].set(p["wo"])
    wA = wA.at[:, W1_OFF:W1_OFF + F].set(p["w1"])

    def row(v):
        v = jnp.asarray(v, jnp.float32).reshape(1, -1)
        return jnp.pad(v, ((0, 0), (0, 128 - v.shape[1])))

    bqkv = jnp.concatenate([p["bq"] * SCALE, p["bk"], p["bv"]], axis=1)   # (1, 3D)
    vecs = jnp.concatenate(
        [row(v) for v in (bqkv, p["bo"], p["b1"], p["b2"],
                          p["g1"], p["be1"], p["g2"], p["be2"])], axis=0)  # (8, 128)
    return wA, p["w2"], vecs


@jax.jit
def encoder_layer(src, wA, w2, vecs):
    """src: (S, B, D) float32 — same axis convention as the PyTorch module."""
    x2d = jnp.transpose(src, (1, 0, 2)).reshape(N, D)
    args = (x2d, wA, w2, vecs)                       # 4 inputs (was 8)
    out2d = pl.pallas_call(
        encoder_layer_kernel,
        out_shape=jax.ShapeDtypeStruct((N, D), jnp.float32),
        in_specs=[_full_spec(a.shape) for a in args],
        out_specs=_full_spec((N, D)),
    )(*args)
    return out2d.reshape(B, S, D).transpose(1, 0, 2)  # back to (S, B, D)


def reference(src, p):
    """Pure-JAX reference mirroring PyTorch forward (eval dropout, batch stats)."""
    x = jnp.transpose(src, (1, 0, 2))                 # (B, S, D)
    q = x @ p["wq"] + p["bq"][0]
    k = x @ p["wk"] + p["bk"][0]
    v = x @ p["wv"] + p["bv"][0]
    split = lambda t: t.reshape(B, S, H, DH).transpose(0, 2, 1, 3)   # (B,H,S,DH)
    qh, kh, vh = split(q), split(k), split(v)
    s = jnp.einsum("bhqd,bhkd->bhqk", qh, kh) / (DH ** 0.5)
    att = jax.nn.softmax(s, axis=-1)
    o = jnp.einsum("bhqk,bhkd->bhqd", att, vh).transpose(0, 2, 1, 3).reshape(B, S, D)
    attn = o @ p["wo"] + p["bo"][0]
    sr = (x + attn).reshape(N, D)
    m1, v1 = sr.mean(0), ((sr - sr.mean(0)) ** 2).mean(0)
    sr = (sr - m1) / jnp.sqrt(v1 + EPS) * p["g1"][0] + p["be1"][0]
    hh = jnp.maximum(sr @ p["w1"] + p["b1"][0], 0.0)
    sr2 = sr + hh @ p["w2"] + p["b2"][0]
    m2, v2 = sr2.mean(0), ((sr2 - sr2.mean(0)) ** 2).mean(0)
    out = (sr2 - m2) / jnp.sqrt(v2 + EPS) * p["g2"][0] + p["be2"][0]
    return out.reshape(B, S, D).transpose(1, 0, 2)


def make_params(key):
    ks = jax.random.split(key, 20)
    n = lambda k, shp, s=0.05: jax.random.normal(k, shp, jnp.float32) * s
    return {
        "wq": n(ks[0], (D, D)), "bq": n(ks[1], (1, D)),
        "wk": n(ks[2], (D, D)), "bk": n(ks[3], (1, D)),
        "wv": n(ks[4], (D, D)), "bv": n(ks[5], (1, D)),
        "wo": n(ks[6], (D, D)), "bo": n(ks[7], (1, D)),
        "w1": n(ks[8], (D, F)), "b1": n(ks[9], (1, F)),
        "w2": n(ks[10], (F, D)), "b2": n(ks[11], (1, D)),
        "g1": 1.0 + n(ks[12], (1, D), 0.1), "be1": n(ks[13], (1, D), 0.1),
        "g2": 1.0 + n(ks[14], (1, D), 0.1), "be2": n(ks[15], (1, D), 0.1),
    }


if __name__ == "__main__":
    key = jax.random.PRNGKey(0)
    k_x, k_p = jax.random.split(key)
    src = jax.random.normal(k_x, (S, B, D), jnp.float32)   # (seq, batch, d_model)
    params = make_params(k_p)

    # Pack parameters ONCE (cached); per-call path is just the jitted wrapper.
    packed = jax.tree_util.tree_map(jax.block_until_ready, pack_params(params))

    out = encoder_layer(src, *packed)
    out = jax.block_until_ready(out)

    ref = reference(src, params)
    max_diff = float(jnp.max(jnp.abs(out - ref)))
    if max_diff > 2e-2:
        raise AssertionError(f"kernel/reference mismatch: max|diff|={max_diff}")
    assert out.shape == (S, B, D)
    print("KERNEL_OK")
</pallas_src>

<mosaic_0001>
module attributes {stable_mosaic.version = 11 : i64} {
  func.func @encoder_layer_kernel(%arg0: memref<16x32xf32, #tpu.memory_space<vmem>>, %arg1: memref<32x384xf32, #tpu.memory_space<vmem>>, %arg2: memref<64x32xf32, #tpu.memory_space<vmem>>, %arg3: memref<8x128xf32, #tpu.memory_space<vmem>>, %arg4: memref<16x32xf32, #tpu.memory_space<vmem>>) attributes {dimension_semantics = [], scalar_prefetch = 0 : i64, scratch_operands = 0 : i64, tpu.core_type = #tpu.core_type<tc>} {
    %c0 = arith.constant 0 : index
    %c0_0 = arith.constant 0 : index
    %0 = vector.load %arg0[%c0, %c0_0] : memref<16x32xf32, #tpu.memory_space<vmem>>, vector<16x32xf32>
    %c0_1 = arith.constant 0 : index
    %c0_2 = arith.constant 0 : index
    %1 = vector.load %arg3[%c0_1, %c0_2] : memref<8x128xf32, #tpu.memory_space<vmem>>, vector<8x128xf32>
    %c0_3 = arith.constant 0 : index
    %c0_4 = arith.constant 0 : index
    %2 = vector.load %arg1[%c0_3, %c0_4] : memref<32x384xf32, #tpu.memory_space<vmem>>, vector<32x96xf32>
    %cst = arith.constant dense<0.000000e+00> : vector<16x96xf32>
    %3 = tpu.matmul %0, %2, %cst {dimension_numbers = #tpu.dot_dimension_numbers<[1], [0], [0], [1], [0, 0, 1, 1], [], []>} : vector<16x32xf32>, vector<32x96xf32>, vector<16x96xf32> -> vector<16x96xf32>
    %4 = vector.extract_strided_slice %1 {offsets = [0, 0], sizes = [1, 96], strides = [1, 1]} : vector<8x128xf32> to vector<1x96xf32>
    %5 = vector.broadcast %4 : vector<1x96xf32> to vector<16x96xf32>
    %6 = arith.addf %3, %5 : vector<16x96xf32>
    %7 = vector.extract_strided_slice %6 {offsets = [0, 0], sizes = [8, 8], strides = [1, 1]} : vector<16x96xf32> to vector<8x8xf32>
    %8 = vector.shape_cast %7 : vector<8x8xf32> to vector<1x8x8xf32>
    %9 = vector.extract_strided_slice %6 {offsets = [0, 8], sizes = [8, 8], strides = [1, 1]} : vector<16x96xf32> to vector<8x8xf32>
    %10 = vector.shape_cast %9 : vector<8x8xf32> to vector<1x8x8xf32>
    %11 = vector.extract_strided_slice %6 {offsets = [0, 16], sizes = [8, 8], strides = [1, 1]} : vector<16x96xf32> to vector<8x8xf32>
    %12 = vector.shape_cast %11 : vector<8x8xf32> to vector<1x8x8xf32>
    %13 = vector.extract_strided_slice %6 {offsets = [0, 24], sizes = [8, 8], strides = [1, 1]} : vector<16x96xf32> to vector<8x8xf32>
    %14 = vector.shape_cast %13 : vector<8x8xf32> to vector<1x8x8xf32>
    %15 = vector.extract_strided_slice %6 {offsets = [8, 0], sizes = [8, 8], strides = [1, 1]} : vector<16x96xf32> to vector<8x8xf32>
    %16 = vector.shape_cast %15 : vector<8x8xf32> to vector<1x8x8xf32>
    %17 = vector.extract_strided_slice %6 {offsets = [8, 8], sizes = [8, 8], strides = [1, 1]} : vector<16x96xf32> to vector<8x8xf32>
    %18 = vector.shape_cast %17 : vector<8x8xf32> to vector<1x8x8xf32>
    %19 = vector.extract_strided_slice %6 {offsets = [8, 16], sizes = [8, 8], strides = [1, 1]} : vector<16x96xf32> to vector<8x8xf32>
    %20 = vector.shape_cast %19 : vector<8x8xf32> to vector<1x8x8xf32>
    %21 = vector.extract_strided_slice %6 {offsets = [8, 24], sizes = [8, 8], strides = [1, 1]} : vector<16x96xf32> to vector<8x8xf32>
    %22 = vector.shape_cast %21 : vector<8x8xf32> to vector<1x8x8xf32>
    %23 = tpu.concatenate %8, %10, %12, %14, %16, %18, %20, %22 in 0 : vector<1x8x8xf32>, vector<1x8x8xf32>, vector<1x8x8xf32>, vector<1x8x8xf32>, vector<1x8x8xf32>, vector<1x8x8xf32>, vector<1x8x8xf32>, vector<1x8x8xf32> -> vector<8x8x8xf32>
    %24 = vector.extract_strided_slice %6 {offsets = [0, 32], sizes = [8, 8], strides = [1, 1]} : vector<16x96xf32> to vector<8x8xf32>
    %25 = vector.shape_cast %24 : vector<8x8xf32> to vector<1x8x8xf32>
    %26 = vector.extract_strided_slice %6 {offsets = [0, 40], sizes = [8, 8], strides = [1, 1]} : vector<16x96xf32> to vector<8x8xf32>
    %27 = vector.shape_cast %26 : vector<8x8xf32> to vector<1x8x8xf32>
    %28 = vector.extract_strided_slice %6 {offsets = [0, 48], sizes = [8, 8], strides = [1, 1]} : vector<16x96xf32> to vector<8x8xf32>
    %29 = vector.shape_cast %28 : vector<8x8xf32> to vector<1x8x8xf32>
    %30 = vector.extract_strided_slice %6 {offsets = [0, 56], sizes = [8, 8], strides = [1, 1]} : vector<16x96xf32> to vector<8x8xf32>
    %31 = vector.shape_cast %30 : vector<8x8xf32> to vector<1x8x8xf32>
    %32 = vector.extract_strided_slice %6 {offsets = [8, 32], sizes = [8, 8], strides = [1, 1]} : vector<16x96xf32> to vector<8x8xf32>
    %33 = vector.shape_cast %32 : vector<8x8xf32> to vector<1x8x8xf32>
    %34 = vector.extract_strided_slice %6 {offsets = [8, 40], sizes = [8, 8], strides = [1, 1]} : vector<16x96xf32> to vector<8x8xf32>
    %35 = vector.shape_cast %34 : vector<8x8xf32> to vector<1x8x8xf32>
    %36 = vector.extract_strided_slice %6 {offsets = [8, 48], sizes = [8, 8], strides = [1, 1]} : vector<16x96xf32> to vector<8x8xf32>
    %37 = vector.shape_cast %36 : vector<8x8xf32> to vector<1x8x8xf32>
    %38 = vector.extract_strided_slice %6 {offsets = [8, 56], sizes = [8, 8], strides = [1, 1]} : vector<16x96xf32> to vector<8x8xf32>
    %39 = vector.shape_cast %38 : vector<8x8xf32> to vector<1x8x8xf32>
    %40 = tpu.concatenate %25, %27, %29, %31, %33, %35, %37, %39 in 0 : vector<1x8x8xf32>, vector<1x8x8xf32>, vector<1x8x8xf32>, vector<1x8x8xf32>, vector<1x8x8xf32>, vector<1x8x8xf32>, vector<1x8x8xf32>, vector<1x8x8xf32> -> vector<8x8x8xf32>
    %41 = vector.extract_strided_slice %6 {offsets = [0, 64], sizes = [8, 8], strides = [1, 1]} : vector<16x96xf32> to vector<8x8xf32>
    %42 = vector.shape_cast %41 : vector<8x8xf32> to vector<1x8x8xf32>
    %43 = vector.extract_strided_slice %6 {offsets = [0, 72], sizes = [8, 8], strides = [1, 1]} : vector<16x96xf32> to vector<8x8xf32>
    %44 = vector.shape_cast %43 : vector<8x8xf32> to vector<1x8x8xf32>
    %45 = vector.extract_strided_slice %6 {offsets = [0, 80], sizes = [8, 8], strides = [1, 1]} : vector<16x96xf32> to vector<8x8xf32>
    %46 = vector.shape_cast %45 : vector<8x8xf32> to vector<1x8x8xf32>
    %47 = vector.extract_strided_slice %6 {offsets = [0, 88], sizes = [8, 8], strides = [1, 1]} : vector<16x96xf32> to vector<8x8xf32>
    %48 = vector.shape_cast %47 : vector<8x8xf32> to vector<1x8x8xf32>
    %49 = vector.extract_strided_slice %6 {offsets = [8, 64], sizes = [8, 8], strides = [1, 1]} : vector<16x96xf32> to vector<8x8xf32>
    %50 = vector.shape_cast %49 : vector<8x8xf32> to vector<1x8x8xf32>
    %51 = vector.extract_strided_slice %6 {offsets = [8, 72], sizes = [8, 8], strides = [1, 1]} : vector<16x96xf32> to vector<8x8xf32>
    %52 = vector.shape_cast %51 : vector<8x8xf32> to vector<1x8x8xf32>
    %53 = vector.extract_strided_slice %6 {offsets = [8, 80], sizes = [8, 8], strides = [1, 1]} : vector<16x96xf32> to vector<8x8xf32>
    %54 = vector.shape_cast %53 : vector<8x8xf32> to vector<1x8x8xf32>
    %55 = vector.extract_strided_slice %6 {offsets = [8, 88], sizes = [8, 8], strides = [1, 1]} : vector<16x96xf32> to vector<8x8xf32>
    %56 = vector.shape_cast %55 : vector<8x8xf32> to vector<1x8x8xf32>
    %57 = tpu.concatenate %42, %44, %46, %48, %50, %52, %54, %56 in 0 : vector<1x8x8xf32>, vector<1x8x8xf32>, vector<1x8x8xf32>, vector<1x8x8xf32>, vector<1x8x8xf32>, vector<1x8x8xf32>, vector<1x8x8xf32>, vector<1x8x8xf32> -> vector<8x8x8xf32>
    "tpu.trace_start"() <{level = 10 : i32, message = "gqd,gkd->gqk"}> : () -> ()
    %cst_5 = arith.constant dense<0.000000e+00> : vector<8x8x8xf32>
    %58 = tpu.matmul %23, %40, %cst_5 {dimension_numbers = #tpu.dot_dimension_numbers<[2], [2], [1], [1], [0, 0, 0, 1, 1, 1], [0], [0]>} : vector<8x8x8xf32>, vector<8x8x8xf32>, vector<8x8x8xf32> -> vector<8x8x8xf32>
    "tpu.trace_stop"() : () -> ()
    %cst_6 = arith.constant dense<0xFF800000> : vector<8x8xf32>
    %59 = vector.multi_reduction <maximumf>, %58, %cst_6 [2] : vector<8x8x8xf32> to vector<8x8xf32>
    %60 = vector.shape_cast %59 : vector<8x8xf32> to vector<8x8x1xf32>
    %61 = vector.broadcast %60 : vector<8x8x1xf32> to vector<8x8x8xf32>
    %62 = arith.subf %58, %61 : vector<8x8x8xf32>
    %63 = math.exp %62 : vector<8x8x8xf32>
    %cst_7 = arith.constant dense<0.000000e+00> : vector<8x8xf32>
    %64 = vector.multi_reduction <add>, %63, %cst_7 [2] : vector<8x8x8xf32> to vector<8x8xf32>
    %65 = vector.shape_cast %64 : vector<8x8xf32> to vector<8x8x1xf32>
    %66 = tpu.reciprocal %65 {approx = true} : vector<8x8x1xf32> -> vector<8x8x1xf32>
    %67 = vector.broadcast %66 : vector<8x8x1xf32> to vector<8x8x8xf32>
    %68 = arith.mulf %63, %67 : vector<8x8x8xf32>
    "tpu.trace_start"() <{level = 10 : i32, message = "gqk,gkd->gqd"}> : () -> ()
    %cst_8 = arith.constant dense<0.000000e+00> : vector<8x8x8xf32>
    %69 = tpu.matmul %68, %57, %cst_8 {dimension_numbers = #tpu.dot_dimension_numbers<[2], [1], [1], [2], [0, 0, 0, 1, 1, 2], [0], [0]>} : vector<8x8x8xf32>, vector<8x8x8xf32>, vector<8x8x8xf32> -> vector<8x8x8xf32>
    "tpu.trace_stop"() : () -> ()
    %70 = vector.extract_strided_slice %69 {offsets = [0, 0, 0], sizes = [1, 8, 8], strides = [1, 1, 1]} : vector<8x8x8xf32> to vector<1x8x8xf32>
    %71 = vector.shape_cast %70 : vector<1x8x8xf32> to vector<8x8xf32>
    %72 = vector.extract_strided_slice %69 {offsets = [1, 0, 0], sizes = [1, 8, 8], strides = [1, 1, 1]} : vector<8x8x8xf32> to vector<1x8x8xf32>
    %73 = vector.shape_cast %72 : vector<1x8x8xf32> to vector<8x8xf32>
    %74 = vector.extract_strided_slice %69 {offsets = [2, 0, 0], sizes = [1, 8, 8], strides = [1, 1, 1]} : vector<8x8x8xf32> to vector<1x8x8xf32>
    %75 = vector.shape_cast %74 : vector<1x8x8xf32> to vector<8x8xf32>
    %76 = vector.extract_strided_slice %69 {offsets = [3, 0, 0], sizes = [1, 8, 8], strides = [1, 1, 1]} : vector<8x8x8xf32> to vector<1x8x8xf32>
    %77 = vector.shape_cast %76 : vector<1x8x8xf32> to vector<8x8xf32>
    %78 = tpu.concatenate %71, %73, %75, %77 in 1 : vector<8x8xf32>, vector<8x8xf32>, vector<8x8xf32>, vector<8x8xf32> -> vector<8x32xf32>
    %79 = vector.extract_strided_slice %69 {offsets = [4, 0, 0], sizes = [1, 8, 8], strides = [1, 1, 1]} : vector<8x8x8xf32> to vector<1x8x8xf32>
    %80 = vector.shape_cast %79 : vector<1x8x8xf32> to vector<8x8xf32>
    %81 = vector.extract_strided_slice %69 {offsets = [5, 0, 0], sizes = [1, 8, 8], strides = [1, 1, 1]} : vector<8x8x8xf32> to vector<1x8x8xf32>
    %82 = vector.shape_cast %81 : vector<1x8x8xf32> to vector<8x8xf32>
    %83 = vector.extract_strided_slice %69 {offsets = [6, 0, 0], sizes = [1, 8, 8], strides = [1, 1, 1]} : vector<8x8x8xf32> to vector<1x8x8xf32>
    %84 = vector.shape_cast %83 : vector<1x8x8xf32> to vector<8x8xf32>
    %85 = vector.extract_strided_slice %69 {offsets = [7, 0, 0], sizes = [1, 8, 8], strides = [1, 1, 1]} : vector<8x8x8xf32> to vector<1x8x8xf32>
    %86 = vector.shape_cast %85 : vector<1x8x8xf32> to vector<8x8xf32>
    %87 = tpu.concatenate %80, %82, %84, %86 in 1 : vector<8x8xf32>, vector<8x8xf32>, vector<8x8xf32>, vector<8x8xf32> -> vector<8x32xf32>
    %88 = tpu.concatenate %78, %87 in 0 : vector<8x32xf32>, vector<8x32xf32> -> vector<16x32xf32>
    %c0_9 = arith.constant 0 : index
    %c128 = arith.constant 128 : index
    %89 = vector.load %arg1[%c0_9, %c128] : memref<32x384xf32, #tpu.memory_space<vmem>>, vector<32x32xf32>
    %cst_10 = arith.constant dense<0.000000e+00> : vector<16x32xf32>
    %90 = tpu.matmul %88, %89, %cst_10 {dimension_numbers = #tpu.dot_dimension_numbers<[1], [0], [0], [1], [0, 0, 1, 1], [], []>} : vector<16x32xf32>, vector<32x32xf32>, vector<16x32xf32> -> vector<16x32xf32>
    %91 = vector.extract_strided_slice %1 {offsets = [1, 0], sizes = [1, 32], strides = [1, 1]} : vector<8x128xf32> to vector<1x32xf32>
    %92 = vector.broadcast %91 : vector<1x32xf32> to vector<16x32xf32>
    %93 = arith.addf %90, %92 : vector<16x32xf32>
    %94 = arith.addf %0, %93 : vector<16x32xf32>
    %cst_11 = arith.constant dense<0.000000e+00> : vector<32xf32>
    %95 = vector.multi_reduction <add>, %94, %cst_11 [0] : vector<16x32xf32> to vector<32xf32>
    %96 = vector.shape_cast %95 : vector<32xf32> to vector<1x32xf32>
    %cst_12 = arith.constant 1.600000e+01 : f32
    %97 = vector.broadcast %cst_12 : f32 to vector<1x32xf32>
    %98 = arith.divf %96, %97 : vector<1x32xf32>
    %99 = vector.broadcast %98 : vector<1x32xf32> to vector<16x32xf32>
    %100 = arith.subf %94, %99 : vector<16x32xf32>
    %101 = arith.mulf %100, %100 : vector<16x32xf32>
    %cst_13 = arith.constant dense<0.000000e+00> : vector<32xf32>
    %102 = vector.multi_reduction <add>, %101, %cst_13 [0] : vector<16x32xf32> to vector<32xf32>
    %103 = vector.shape_cast %102 : vector<32xf32> to vector<1x32xf32>
    %cst_14 = arith.constant 1.600000e+01 : f32
    %104 = vector.broadcast %cst_14 : f32 to vector<1x32xf32>
    %105 = arith.divf %103, %104 : vector<1x32xf32>
    %cst_15 = arith.constant 9.99999974E-6 : f32
    %106 = vector.broadcast %cst_15 : f32 to vector<1x32xf32>
    %107 = arith.addf %105, %106 : vector<1x32xf32>
    %108 = math.rsqrt %107 : vector<1x32xf32>
    %109 = vector.extract_strided_slice %1 {offsets = [4, 0], sizes = [1, 32], strides = [1, 1]} : vector<8x128xf32> to vector<1x32xf32>
    %110 = arith.mulf %108, %109 : vector<1x32xf32>
    %111 = vector.broadcast %110 : vector<1x32xf32> to vector<16x32xf32>
    %112 = arith.mulf %100, %111 : vector<16x32xf32>
    %113 = vector.extract_strided_slice %1 {offsets = [5, 0], sizes = [1, 32], strides = [1, 1]} : vector<8x128xf32> to vector<1x32xf32>
    %114 = vector.broadcast %113 : vector<1x32xf32> to vector<16x32xf32>
    %115 = arith.addf %112, %114 : vector<16x32xf32>
    %c0_16 = arith.constant 0 : index
    %c256 = arith.constant 256 : index
    %116 = vector.load %arg1[%c0_16, %c256] : memref<32x384xf32, #tpu.memory_space<vmem>>, vector<32x64xf32>
    %cst_17 = arith.constant dense<0.000000e+00> : vector<16x64xf32>
    %117 = tpu.matmul %115, %116, %cst_17 {dimension_numbers = #tpu.dot_dimension_numbers<[1], [0], [0], [1], [0, 0, 1, 1], [], []>} : vector<16x32xf32>, vector<32x64xf32>, vector<16x64xf32> -> vector<16x64xf32>
    %118 = vector.extract_strided_slice %1 {offsets = [2, 0], sizes = [1, 64], strides = [1, 1]} : vector<8x128xf32> to vector<1x64xf32>
    %119 = vector.broadcast %118 : vector<1x64xf32> to vector<16x64xf32>
    %120 = arith.addf %117, %119 : vector<16x64xf32>
    %cst_18 = arith.constant 0.000000e+00 : f32
    %121 = vector.broadcast %cst_18 : f32 to vector<16x64xf32>
    %122 = arith.maximumf %120, %121 : vector<16x64xf32>
    %c0_19 = arith.constant 0 : index
    %c0_20 = arith.constant 0 : index
    %123 = vector.load %arg2[%c0_19, %c0_20] : memref<64x32xf32, #tpu.memory_space<vmem>>, vector<64x32xf32>
    %cst_21 = arith.constant dense<0.000000e+00> : vector<16x32xf32>
    %124 = tpu.matmul %122, %123, %cst_21 {dimension_numbers = #tpu.dot_dimension_numbers<[1], [0], [0], [1], [0, 0, 1, 1], [], []>} : vector<16x64xf32>, vector<64x32xf32>, vector<16x32xf32> -> vector<16x32xf32>
    %125 = vector.extract_strided_slice %1 {offsets = [3, 0], sizes = [1, 32], strides = [1, 1]} : vector<8x128xf32> to vector<1x32xf32>
    %126 = vector.broadcast %125 : vector<1x32xf32> to vector<16x32xf32>
    %127 = arith.addf %124, %126 : vector<16x32xf32>
    %128 = arith.addf %115, %127 : vector<16x32xf32>
    %cst_22 = arith.constant dense<0.000000e+00> : vector<32xf32>
    %129 = vector.multi_reduction <add>, %128, %cst_22 [0] : vector<16x32xf32> to vector<32xf32>
    %130 = vector.shape_cast %129 : vector<32xf32> to vector<1x32xf32>
    %cst_23 = arith.constant 1.600000e+01 : f32
    %131 = vector.broadcast %cst_23 : f32 to vector<1x32xf32>
    %132 = arith.divf %130, %131 : vector<1x32xf32>
    %133 = vector.broadcast %132 : vector<1x32xf32> to vector<16x32xf32>
    %134 = arith.subf %128, %133 : vector<16x32xf32>
    %135 = arith.mulf %134, %134 : vector<16x32xf32>
    %cst_24 = arith.constant dense<0.000000e+00> : vector<32xf32>
    %136 = vector.multi_reduction <add>, %135, %cst_24 [0] : vector<16x32xf32> to vector<32xf32>
    %137 = vector.shape_cast %136 : vector<32xf32> to vector<1x32xf32>
    %cst_25 = arith.constant 1.600000e+01 : f32
    %138 = vector.broadcast %cst_25 : f32 to vector<1x32xf32>
    %139 = arith.divf %137, %138 : vector<1x32xf32>
    %cst_26 = arith.constant 9.99999974E-6 : f32
    %140 = vector.broadcast %cst_26 : f32 to vector<1x32xf32>
    %141 = arith.addf %139, %140 : vector<1x32xf32>
    %142 = math.rsqrt %141 : vector<1x32xf32>
    %143 = vector.extract_strided_slice %1 {offsets = [6, 0], sizes = [1, 32], strides = [1, 1]} : vector<8x128xf32> to vector<1x32xf32>
    %144 = arith.mulf %142, %143 : vector<1x32xf32>
    %145 = vector.broadcast %144 : vector<1x32xf32> to vector<16x32xf32>
    %146 = arith.mulf %134, %145 : vector<16x32xf32>
    %147 = vector.extract_strided_slice %1 {offsets = [7, 0], sizes = [1, 32], strides = [1, 1]} : vector<8x128xf32> to vector<1x32xf32>
    %148 = vector.broadcast %147 : vector<1x32xf32> to vector<16x32xf32>
    %149 = arith.addf %146, %148 : vector<16x32xf32>
    %c0_27 = arith.constant 0 : index
    %c0_28 = arith.constant 0 : index
    %150 = vector.load %arg4[%c0_27, %c0_28] : memref<16x32xf32, #tpu.memory_space<vmem>>, vector<16x32xf32>
    tpu.vector_store %arg4[%c0_27, %c0_28], %149 {strides = array<i32>} : memref<16x32xf32, #tpu.memory_space<vmem>>, vector<16x32xf32>,
    return
  }
}

</mosaic_0001>

<bundles_post_ra>
// kernel: encoder_layer.1
= control target key start
LH: loop header
LB: loop body
LE: loop exit
PB: predicated region body
PF: predicated region fallthrough
CT: control target
= control target key end

     0   :  { %9 = vsyncpa [#allocation3], 0  ;;  %s2130_s15 = smov [#allocation2]   ;;  %s2441_s0 = inlined_call_operand.vmem [shape: f32[16,32], index: 0, kind: input, shape index: {}]   ;;  %s2442_s1 = inlined_call_operand.vmem [shape: f32[32,384], index: 1, kind: input, shape index: {}]   ;;  %s2443_s2 = inlined_call_operand.vmem [shape: f32[64,32], index: 2, kind: input, shape index: {}]   ;;  %s2444_s3 = inlined_call_operand.hbm [shape: f32[8,128], index: 3, kind: input, shape index: {}]   ;;  %s2445_s4 = inlined_call_operand.vmem [shape: f32[16,32], index: 4, kind: output, shape index: {}]  }
   0x1   :  { %s22_s16 = sshll.u32 %s2130_s15, 4  ;;  %s23_s16 = int_to_ptr.vmem [resolvable:$true] %s22_s16 }
   0x2   :  { %s2116_s17 = scalar_lea.vmem %s23_s16, 128  ;;  %p2121_p1 = scmp.lt.s32.totalorder %s23_s16, %s23_s16 }
   0x3   :  { %p2117_p0 = scmp.ne.s32.totalorder %s23_s16, %s2116_s17  ;;  %p2122_p2 = scmp.lt.s32.totalorder %s2116_s17, %s2116_s17 }
   0x5   :  { %p2123_p3 = por %p2122_p2, %p2121_p1 }
   0x7   :  { %p2124_p4 = pnand %p2123_p3, %p2117_p0 }
   0x9   :  { %2127 = shalt.err (!%p2124_p4)
}
   0xa   :  { %25 = dma.hbm_to_vmem [thread:$0]  %s2444_s3, 128, %s23_s16, [#allocation3]  }
   0xb   :  { %2128 = dma.done.wait [#allocation3], 128  }
   0xc   :  { %2129 = vsyncadd [#allocation3], 4294967168  ;;  %vm40_vm0 = vcmask 261120   ;;  %v35_v0 = vld [vmem:[%s2442_s1 + $0x48] sm:$0xff]  ;;  %v34_v1 = vld [vmem:[%s2442_s1 + $0x30] sm:$0xff]  ;;  %v36_v6 = vlaneseq  ;;  %v2131_v12 = vmov 0.0  }
   0xd   :  { %1929 = vmatprep.subr.mxu1 %v35_v0  ;;  %v2178_v2 = vld [vmem:[%s2441_s0] sm:$0xff]  ;;  %v33_v3 = vld [vmem:[%s2442_s1 + $0x18] sm:$0xff]  ;;  %v2191_v5 = vld [vmem:[%s2441_s0 + $0x8] sm:$0xff]  ;;  %1950 = vmatprep.subr.mxu0 %v2131_v12  ;;  %s2132_s0 = smov 104   ;;  %s2133_s5 = smov 120   ;;  %vm2134_vm1 = vmmov 0  }
   0xe   :  { %1930 = vmatpush3.msra.mxu1 %v35_v0  ;;  %1937 = vmatprep.mubr.msk.f32.mxu1 %vm40_vm0, %v2178_v2  ;;  %v32_v4 = vld [vmem:[%s2442_s1] sm:$0xff]  ;;  %v2195_v7 = vshrl.u32 %v36_v6, 7  ;;  %s2135_s6 = smov 112   ;;  %s2136_s7 = smov 96   ;;  %vm138_vm2 = vcmask 64512   ;;  %vm1454_vm3 = vcmask 130048  }
   0xf   :  { %1931 = vmatprep.subr.mxu1 %v34_v1  ;;  %v2198_v9 = vld [vmem:[#allocation2] sm:$0xff]  ;;  %1952 = vmatprep.mubr.msk.f32.mxu0 %vm2134_vm1, %v2131_v12  ;;  %s2137_s8 = smov 64   ;;  %s2138_s11 = smov 8   ;;  %vm1456_vm4 = vcmask 195584   ;;  %vm1707_vm5 = vcmask 523264  }
  0x10   :  { %1932 = vmatpush3.msra.mxu1 %v34_v1  ;;  %v38_v8 = vsub.s32 0, %v2195_v7  ;;  %s2139_s16 = smov 16   ;;  %s2140_s19 = smov 24  }
  0x11   :  { %1933 = vmatprep.subr.mxu1 %v33_v3 }
  0x12   :  { %1934 = vmatpush3.msra.mxu1 %v33_v3  ;;  %v39_v11 = vrot.slane %v2198_v9, %v38_v8 }
  0x13   :  { %1935 = vmatprep.subr.mxu1 %v32_v4 }
  0x14   :  { %1936 = vmatpush3.msra.mxu1 %v32_v4 }
  0x15   :  { %1938 = vmatmul.mubr.msk.f32.vlgmr.msra.gmra.mxu1 %vm40_vm0, %v2191_v5  ;;  %1940 = vmatprep.subr.mxu1 %v2131_v12 }
  0x16   :  { %1942 = vmatprep.mubr.msk.f32.mxu1 %vm2134_vm1, %v2131_v12 }
  0xd5   :  { %v1939_v10 = vpop.f32.mrf.mxu1 }
  0xd6   :  { %v2211_v15 = vadd.f32 %v1939_v10, %v39_v11 }
  0xd7   :  { %v113_v13 = vpop.f32.mrf.mxu1 }
  0xd8   :  { %v2203_v14 = vadd.f32 %v113_v13, %v39_v11 }
  0xda   :  { %127 = vrot.lane.b32.xlu1 %v2203_v14, %s2132_s0  ;;  %123 = vrot.lane.b32.xlu0 %v2203_v14, %s2133_s5 }
  0xde   :  { %130 = vrot.lane.b32.xlu1 %v2211_v15, %s2133_s5  ;;  %125 = vrot.lane.b32.xlu0 %v2203_v14, %s2135_s6 }
  0xe2   :  { %134 = vrot.lane.b32.xlu1 %v2211_v15, %s2132_s0  ;;  %132 = vrot.lane.b32.xlu0 %v2211_v15, %s2135_s6 }
  0xe6   :  { %136 = vrot.lane.b32.xlu0 %v2203_v14, %s2136_s7 }
 0x14c   :  { %v2218_v16 = vpop.permute.xlu1 %127  ;;  %v2220_v17 = vpop.permute.xlu0 %123 }
 0x14d   :  { %213 = vrot.lane.b32.xlu1 %v2220_v17, %s2136_s7 }
 0x150   :  { %v2223_v18 = vpop.permute.xlu0 %125  ;;  %v2227_v19 = vpop.permute.xlu1 %130 }
 0x151   :  { %365 = vrot.lane.b32.xlu1 %v2218_v16, %s2136_s7  ;;  %289 = vrot.lane.b32.xlu0 %v2223_v18, %s2136_s7 }
 0x154   :  { %v2229_v20 = vpop.permute.xlu0 %132  ;;  %v2233_v21 = vpop.permute.xlu1 %134 }
 0x155   :  { %517 = vrot.lane.b32.xlu1 %v2227_v19, %s2136_s7  ;;  %441 = vrot.lane.b32.xlu0 %v2211_v15, %s2136_s7 }
 0x158   :  { %v137_v22 = vpop.permute.xlu0 %136 }
 0x159   :  { %669 = vrot.lane.b32.xlu1 %v2233_v21, %s2136_s7  ;;  %593 = vrot.lane.b32.xlu0 %v2229_v20, %s2136_s7 }
 0x15a   :  { %1941 = vmatpush3.xpose.msk.msra.mxu1 %vm138_vm2, %v137_v22 }
 0x15b   :  { %1945 = vmatprep.subr.mxu1 %v2131_v12 }
 0x15d   :  { %1943 = vmatmul.mubr.msk.f32.vlgmr.msra.gmra.mxu1 %vm138_vm2, %v2203_v14 }
 0x15e   :  { %1947 = vmatprep.mubr.msk.f32.mxu1 %vm2134_vm1, %v2131_v12 }
 0x1bf   :  { %v214_v23 = vpop.permute.xlu1 %213 }
 0x1c0   :  { %1946 = vmatpush3.xpose.msk.msra.mxu1 %vm138_vm2, %v214_v23 }
 0x1c1   :  { %1955 = vmatprep.subr.mxu1 %v2131_v12 }
 0x1c3   :  { %v366_v24 = vpop.permute.xlu1 %365  ;;  %1948 = vmatmul.mubr.msk.f32.vlgmr.msra.gmra.mxu1 %vm138_vm2, %v2220_v17  ;;  %v290_v25 = vpop.permute.xlu0 %289 }
 0x1c4   :  { %1951 = vmatpush3.xpose.msk.msra.mxu0 %vm138_vm2, %v290_v25  ;;  %1956 = vmatpush3.xpose.msk.msra.mxu1 %vm138_vm2, %v366_v24 }
 0x1c5   :  { %1957 = vmatprep.mubr.msk.f32.mxu1 %vm2134_vm1, %v2131_v12  ;;  %1960 = vmatprep.subr.mxu0 %v2131_v12 }
 0x1c6   :  { %1965 = vmatprep.subr.mxu1 %v2131_v12 }
 0x1c7   :  { %v518_v26 = vpop.permute.xlu1 %517  ;;  %1953 = vmatmul.mubr.msk.f32.vlgmr.msra.gmra.mxu0 %vm138_vm2, %v2223_v18  ;;  %1958 = vmatmul.mubr.msk.f32.vlgmr.msra.gmra.mxu1 %vm138_vm2, %v2218_v16  ;;  %v442_v27 = vpop.permute.xlu0 %441 }
 0x1c8   :  { %1961 = vmatpush3.xpose.msk.msra.mxu0 %vm138_vm2, %v442_v27  ;;  %1966 = vmatpush3.xpose.msk.msra.mxu1 %vm138_vm2, %v518_v26 }
 0x1c9   :  { %1962 = vmatprep.mubr.msk.f32.mxu0 %vm2134_vm1, %v2131_v12  ;;  %1967 = vmatprep.mubr.msk.f32.mxu1 %vm2134_vm1, %v2131_v12 }
 0x1ca   :  { %1970 = vmatprep.subr.mxu0 %v2131_v12  ;;  %1975 = vmatprep.subr.mxu1 %v2131_v12 }
 0x1cb   :  { %v670_v28 = vpop.permute.xlu1 %669  ;;  %1963 = vmatmul.mubr.msk.f32.vlgmr.msra.gmra.mxu0 %vm138_vm2, %v2211_v15  ;;  %1968 = vmatmul.mubr.msk.f32.vlgmr.msra.gmra.mxu1 %vm138_vm2, %v2227_v19  ;;  %v594_v29 = vpop.permute.xlu0 %593 }
 0x1cc   :  { %1971 = vmatpush3.xpose.msk.msra.mxu0 %vm138_vm2, %v594_v29  ;;  %1976 = vmatpush3.xpose.msk.msra.mxu1 %vm138_vm2, %v670_v28 }
 0x1cd   :  { %1972 = vmatprep.mubr.msk.f32.mxu0 %vm2134_vm1, %v2131_v12  ;;  %1977 = vmatprep.mubr.msk.f32.mxu1 %vm2134_vm1, %v2131_v12 }
 0x1ce   :  { %1980 = vmatprep.subr.mxu0 %v2131_v12  ;;  %1985 = vmatprep.subr.mxu1 %v2131_v12 }
 0x1cf   :  { %1973 = vmatmul.mubr.msk.f32.vlgmr.msra.gmra.mxu0 %vm138_vm2, %v2229_v20  ;;  %1978 = vmatmul.mubr.msk.f32.vlgmr.msra.gmra.mxu1 %vm138_vm2, %v2233_v21 }
 0x1d0   :  { %1982 = vmatprep.mubr.msk.f32.mxu0 %vm2134_vm1, %v2131_v12  ;;  %1987 = vmatprep.mubr.msk.f32.mxu1 %vm2134_vm1, %v2131_v12 }
 0x21d   :  { %v209_v30 = vpop.f32.mrf.mxu1 }
 0x21e   :  { %v745_v31 = vsel %vm138_vm2, %v209_v30, -inf }
 0x21f   :  { %746 = vmax.xlane.f32.xlu0 %v745_v31  ;;  %v1944_v32 = vpop.f32.mrf.mxu1 }
 0x283   :  { %v285_v33 = vpop.f32.mrf.mxu1 }
 0x284   :  { %v748_v34 = vsel %vm138_vm2, %v285_v33, -inf }
 0x285   :  { %749 = vmax.xlane.f32.xlu1 %v748_v34  ;;  %v1949_v35 = vpop.f32.mrf.mxu1 }
 0x287   :  { %v361_v36 = vpop.f32.mrf.mxu0  ;;  %v437_v37 = vpop.f32.mrf.mxu1 }
 0x288   :  { %v751_v38 = vsel %vm138_vm2, %v361_v36, -inf  ;;  %v754_v43 = vsel %vm138_vm2, %v437_v37, -inf }
 0x289   :  { %v1959_v39 = vpop.f32.mrf.mxu1  ;;  %752 = vmax.xlane.f32.xlu0 %v751_v38  ;;  %v1954_v40 = vpop.f32.mrf.mxu0 }
 0x28b   :  { %v513_v41 = vpop.f32.mrf.mxu0  ;;  %v589_v42 = vpop.f32.mrf.mxu1 }
 0x28c   :  { %v757_v44 = vsel %vm138_vm2, %v513_v41, -inf  ;;  %v760_v49 = vsel %vm138_vm2, %v589_v42, -inf }
 0x28d   :  { %v1969_v45 = vpop.f32.mrf.mxu1  ;;  %755 = vmax.xlane.f32.xlu0 %v754_v43  ;;  %758 = vmax.xlane.f32.xlu1 %v757_v44  ;;  %v1964_v46 = vpop.f32.mrf.mxu0 }
 0x28f   :  { %v665_v47 = vpop.f32.mrf.mxu0  ;;  %v741_v48 = vpop.f32.mrf.mxu1 }
 0x290   :  { %v763_v50 = vsel %vm138_vm2, %v665_v47, -inf  ;;  %v766_v53 = vsel %vm138_vm2, %v741_v48, -inf }
 0x291   :  { %v1979_v51 = vpop.f32.mrf.mxu1  ;;  %761 = vmax.xlane.f32.xlu0 %v760_v49  ;;  %764 = vmax.xlane.f32.xlu1 %v763_v50  ;;  %v1974_v52 = vpop.f32.mrf.mxu0 }
 0x295   :  { %767 = vmax.xlane.f32.xlu0 %v766_v53 }
 0x2a2   :  { %833 = vrot.lane.b32.xlu1 %v2203_v14, %s2137_s8 }
 0x2a6   :  { %985 = vrot.lane.b32.xlu1 %v2223_v18, %s2137_s8 }
 0x2a8   :  { %v747_v54 = vpop.xlane.xlu0 %746 }
 0x2a9   :  { %v769_v55 = vsub.f32 %v209_v30, %v747_v54 }
 0x2aa   :  { %1061 = vrot.lane.b32.xlu1 %v2218_v16, %s2137_s8 }
 0x2ab   :  { %909 = vrot.lane.b32.xlu0 %v2220_v17, %s2137_s8  ;;  %v777_v56 = vmul.f32 1.442695, %v769_v55 }
 0x2ad   :  { %2072 = vpow2.f32 %v777_v56 }
 0x2ae   :  { %1213 = vrot.lane.b32.xlu1 %v2227_v19, %s2137_s8 }
 0x2af   :  { %1137 = vrot.lane.b32.xlu0 %v2211_v15, %s2137_s8 }
 0x2ba   :  { %v2305_v57 = vpop.eup %2072 }
 0x2bb   :  { %v793_v58 = vsel %vm138_vm2, %v2305_v57, 0.0 }
 0x2d2   :  { %794 = vadd.xlane.f32.xlu1 %v793_v58 }
 0x30e   :  { %v750_v59 = vpop.xlane.xlu1 %749 }
 0x30f   :  { %v770_v60 = vsub.f32 %v285_v33, %v750_v59 }
 0x311   :  { %v779_v61 = vmul.f32 1.442695, %v770_v60 }
 0x312   :  { %v753_v62 = vpop.xlane.xlu0 %752 }
 0x313   :  { %2074 = vpow2.f32 %v779_v61  ;;  %v771_v63 = vsub.f32 %v361_v36, %v753_v62 }
 0x315   :  { %v781_v0 = vmul.f32 1.442695, %v771_v63 }
 0x316   :  { %v759_v1 = vpop.xlane.xlu1 %758  ;;  %v756_v3 = vpop.xlane.xlu0 %755 }
 0x317   :  { %2076 = vpow2.f32 %v781_v0  ;;  %v773_v4 = vsub.f32 %v513_v41, %v759_v1  ;;  %v772_v6 = vsub.f32 %v437_v37, %v756_v3 }
 0x319   :  { %v785_v8 = vmul.f32 1.442695, %v773_v4  ;;  %v783_v10 = vmul.f32 1.442695, %v772_v6 }
 0x31a   :  { %v765_v11 = vpop.xlane.xlu1 %764  ;;  %v762_v13 = vpop.xlane.xlu0 %761 }
 0x31b   :  { %2078 = vpow2.f32 %v785_v8  ;;  %v775_v14 = vsub.f32 %v665_v47, %v765_v11  ;;  %v774_v15 = vsub.f32 %v589_v42, %v762_v13  ;;  %v1476_v8 = vld [vmem:[%s2442_s1 + $0x50] sm:$0xff]  ;;  %v1475_v11 = vld [vmem:[%s2442_s1 + $0x38] sm:$0xff] }
 0x31c   :  { %2080 = vpow2.f32 %v783_v10 }
 0x31d   :  { %v789_v16 = vmul.f32 1.442695, %v775_v14  ;;  %v787_v17 = vmul.f32 1.442695, %v774_v15  ;;  %v1473_v15 = vld [vmem:[%s2442_s1 + $0x8] sm:$0xff] }
 0x31e   :  { %v834_v18 = vpop.permute.xlu1 %833  ;;  %v768_v19 = vpop.xlane.xlu0 %767 }
 0x31f   :  { %2082 = vpow2.f32 %v789_v16  ;;  %v776_v22 = vsub.f32 %v741_v48, %v768_v19  ;;  %1981 = vmatpush3.msra.mxu0 %v834_v18 }
 0x320   :  { %v2075_v23 = vpop.eup %2074  ;;  %2084 = vpow2.f32 %v787_v17  ;;  %1990 = vmatprep.subr.mxu0 %v2131_v12 }
 0x321   :  { %v791_v24 = vmul.f32 1.442695, %v776_v22  ;;  %v796_v25 = vsel %vm138_vm2, %v2075_v23, 0.0 }
 0x322   :  { %797 = vadd.xlane.f32.xlu0 %v796_v25  ;;  %v910_v26 = vpop.permute.xlu0 %909  ;;  %v986_v39 = vpop.permute.xlu1 %985 }
 0x323   :  { %2086 = vpow2.f32 %v791_v24  ;;  %1986 = vmatpush3.msra.mxu1 %v910_v26 }
 0x324   :  { %v2077_v27 = vpop.eup %2076  ;;  %1995 = vmatprep.subr.mxu1 %v2131_v12 }
 0x325   :  { %v799_v28 = vsel %vm138_vm2, %v2077_v27, 0.0 }
 0x326   :  { %800 = vadd.xlane.f32.xlu1 %v799_v28  ;;  %v1062_v40 = vpop.permute.xlu1 %1061 }
 0x328   :  { %v2079_v29 = vpop.eup %2078 }
 0x329   :  { %v2081_v30 = vpop.eup %2080  ;;  %v805_v31 = vsel %vm138_vm2, %v2079_v29, 0.0 }
 0x32a   :  { %806 = vadd.xlane.f32.xlu1 %v805_v31  ;;  %v802_v32 = vsel %vm138_vm2, %v2081_v30, 0.0  ;;  %v1214_v41 = vpop.permute.xlu1 %1213 }
 0x32b   :  { %803 = vadd.xlane.f32.xlu0 %v802_v32 }
 0x32c   :  { %v2083_v33 = vpop.eup %2082 }
 0x32d   :  { %v2315_v34 = vpop.eup %2084  ;;  %v811_v35 = vsel %vm138_vm2, %v2083_v33, 0.0 }
 0x32e   :  { %812 = vadd.xlane.f32.xlu1 %v811_v35  ;;  %v808_v36 = vsel %vm138_vm2, %v2315_v34, 0.0 }
 0x32f   :  { %809 = vadd.xlane.f32.xlu0 %v808_v36 }
 0x330   :  { %v2320_v37 = vpop.eup %2086 }
 0x331   :  { %v814_v38 = vsel %vm138_vm2, %v2320_v37, 0.0 }
 0x333   :  { %815 = vadd.xlane.f32.xlu0 %v814_v38 }
 0x33f   :  { %1365 = vrot.lane.b32.xlu1 %v2233_v21, %s2137_s8  ;;  %v1138_v21 = vpop.permute.xlu0 %1137 }
 0x349   :  { %1289 = vrot.lane.b32.xlu0 %v2229_v20, %s2137_s8 }
 0x35b   :  { %v795_v42 = vpop.xlane.xlu1 %794 }
 0x35c   :  { %2088 = vrcp.f32 %v795_v42  ;;  %v1606_v42 = vld [vmem:[%s2442_s1 + $0x40] sm:$0xff] }
 0x369   :  { %v2089_v43 = vpop.eup %2088 }
 0x36a   :  { %v825_v44 = vmul.f32 %v2089_v43, %v2305_v57  ;;  %v1605_v43 = vld [vmem:[%s2442_s1 + $0x28] sm:$0xff] }
 0x36c   :  { %1983 = vmatmul.mubr.msk.f32.vlgmr.msra.gmra.mxu0 %vm138_vm2, %v825_v44  ;;  %v1604_v44 = vld [vmem:[%s2442_s1 + $0x10] sm:$0xff] }
 0x36d   :  { %1991 = vmatpush3.msra.mxu0 %v986_v39  ;;  %1992 = vmatprep.mubr.msk.f32.mxu0 %vm2134_vm1, %v2131_v12 }
 0x36e   :  { %2000 = vmatprep.subr.mxu0 %v2131_v12 }
 0x3ab   :  { %v798_v45 = vpop.xlane.xlu0 %797 }
 0x3ac   :  { %2090 = vrcp.f32 %v798_v45  ;;  %v1701_v45 = vld [vmem:[%s2443_s2 + $0x30] sm:$0xff] }
 0x3af   :  { %v801_v20 = vpop.xlane.xlu1 %800 }
 0x3b0   :  { %2092 = vrcp.f32 %v801_v20  ;;  %v1700_v20 = vld [vmem:[%s2443_s2 + $0x28] sm:$0xff] }
 0x3b3   :  { %v807_v46 = vpop.xlane.xlu1 %806 }
 0x3b4   :  { %2094 = vrcp.f32 %v807_v46  ;;  %v804_v47 = vpop.xlane.xlu0 %803  ;;  %v1699_v46 = vld [vmem:[%s2443_s2 + $0x20] sm:$0xff] }
 0x3b5   :  { %2096 = vrcp.f32 %v804_v47  ;;  %v1479_v47 = vsub.s32 1, %v2195_v7 }
 0x3b7   :  { %v813_v48 = vpop.xlane.xlu1 %812 }
 0x3b8   :  { %2098 = vrcp.f32 %v813_v48  ;;  %v810_v49 = vpop.xlane.xlu0 %809  ;;  %v1480_v48 = vrot.slane %v2198_v9, %v1479_v47 }
 0x3b9   :  { %v2091_v50 = vpop.eup %2090  ;;  %2100 = vrcp.f32 %v810_v49 }
 0x3ba   :  { %v826_v51 = vmul.f32 %v2091_v50, %v2075_v23 }
 0x3bb   :  { %v1366_v0 = vpop.permute.xlu1 %1365 }
 0x3bc   :  { %v816_v52 = vpop.xlane.xlu0 %815  ;;  %1988 = vmatmul.mubr.msk.f32.vlgmr.msra.gmra.mxu1 %vm138_vm2, %v826_v51 }
 0x3bd   :  { %v2093_v53 = vpop.eup %2092  ;;  %2102 = vrcp.f32 %v816_v52  ;;  %1996 = vmatpush3.msra.mxu1 %v1062_v40  ;;  %1997 = vmatprep.mubr.msk.f32.mxu1 %vm2134_vm1, %v2131_v12 }
 0x3be   :  { %v827_v54 = vmul.f32 %v2093_v53, %v2077_v27  ;;  %2005 = vmatprep.subr.mxu1 %v2131_v12 }
 0x3c0   :  { %1993 = vmatmul.mubr.msk.f32.vlgmr.msra.gmra.mxu0 %vm138_vm2, %v827_v54  ;;  %v1290_v59 = vpop.permute.xlu0 %1289 }
 0x3c1   :  { %v2095_v55 = vpop.eup %2094  ;;  %2001 = vmatpush3.msra.mxu0 %v1138_v21  ;;  %2002 = vmatprep.mubr.msk.f32.mxu0 %vm2134_vm1, %v2131_v12  ;;  %v1702_v21 = vld [vmem:[%s2443_s2 + $0x38] sm:$0xff] }
 0x3c2   :  { %v2097_v56 = vpop.eup %2096  ;;  %2010 = vmatprep.subr.mxu0 %v2131_v12  ;;  %v829_v57 = vmul.f32 %v2095_v55, %v2079_v29 }
 0x3c3   :  { %v828_v58 = vmul.f32 %v2097_v56, %v2081_v30 }
 0x3c4   :  { %2003 = vmatmul.mubr.msk.f32.vlgmr.msra.gmra.mxu0 %vm138_vm2, %v829_v57 }
 0x3c5   :  { %v2099_v60 = vpop.eup %2098  ;;  %1998 = vmatmul.mubr.msk.f32.vlgmr.msra.gmra.mxu1 %vm138_vm2, %v828_v58  ;;  %2011 = vmatpush3.msra.mxu0 %v1290_v59 }
 0x3c6   :  { %v2101_v61 = vpop.eup %2100  ;;  %2006 = vmatpush3.msra.mxu1 %v1214_v41  ;;  %2007 = vmatprep.mubr.msk.f32.mxu1 %vm2134_vm1, %v2131_v12  ;;  %v831_v62 = vmul.f32 %v2099_v60, %v2083_v33  ;;  %v1607_v41 = vld [vmem:[%s2442_s1 + $0x58] sm:$0xff] }
 0x3c7   :  { %2012 = vmatprep.mubr.msk.f32.mxu0 %vm2134_vm1, %v2131_v12  ;;  %2015 = vmatprep.subr.mxu1 %v2131_v12  ;;  %v830_v63 = vmul.f32 %v2101_v61, %v2315_v34 }
 0x3c8   :  { %2013 = vmatmul.mubr.msk.f32.vlgmr.msra.gmra.mxu0 %vm138_vm2, %v831_v62  ;;  %2020 = vmatprep.subr.mxu0 %v1476_v8 }
 0x3c9   :  { %2008 = vmatmul.mubr.msk.f32.vlgmr.msra.gmra.mxu1 %vm138_vm2, %v830_v63  ;;  %2021 = vmatpush3.msra.mxu0 %v1476_v8 }
 0x3ca   :  { %v2103_v1 = vpop.eup %2102  ;;  %2016 = vmatpush3.msra.mxu1 %v1366_v0  ;;  %2017 = vmatprep.mubr.msk.f32.mxu1 %vm2134_vm1, %v2131_v12  ;;  %v1474_v12 = vld [vmem:[%s2442_s1 + $0x20] sm:$0xff] }
 0x3cb   :  { %v832_v3 = vmul.f32 %v2103_v1, %v2320_v37  ;;  %2022 = vmatprep.subr.mxu0 %v1475_v11  ;;  %2031 = vmatprep.subr.mxu1 %v1607_v41 }
 0x3cc   :  { %2023 = vmatpush3.msra.mxu0 %v1475_v11 }
 0x3cd   :  { %2018 = vmatmul.mubr.msk.f32.vlgmr.msra.gmra.mxu1 %vm138_vm2, %v832_v3  ;;  %2024 = vmatprep.subr.mxu0 %v1474_v12 }
 0x3ce   :  { %2025 = vmatpush3.msra.mxu0 %v1474_v12  ;;  %2032 = vmatpush3.msra.mxu1 %v1607_v41 }
 0x3cf   :  { %2026 = vmatprep.subr.mxu0 %v1473_v15  ;;  %2033 = vmatprep.subr.mxu1 %v1606_v42 }
 0x3d0   :  { %2027 = vmatpush3.msra.mxu0 %v1473_v15  ;;  %2034 = vmatpush3.msra.mxu1 %v1606_v42  ;;  %v1705_v42 = vsub.s32 3, %v2195_v7 }
 0x3d1   :  { %2035 = vmatprep.subr.mxu1 %v1605_v43  ;;  %2042 = vmatprep.subr.mxu0 %v1702_v21 }
 0x3d2   :  { %2036 = vmatpush3.msra.mxu1 %v1605_v43  ;;  %v1706_v43 = vrot.slane %v2198_v9, %v1705_v42 }
 0x3d3   :  { %2037 = vmatprep.subr.mxu1 %v1604_v44 }
 0x3d4   :  { %2038 = vmatpush3.msra.mxu1 %v1604_v44 }
 0x42c   :  { %v905_v4 = vpop.f32.mrf.mxu0 }
 0x42e   :  { %v1984_v6 = vpop.f32.mrf.mxu0 }
 0x47c   :  { %v981_v10 = vpop.f32.mrf.mxu1 }
 0x47d   :  { %1442 = vrot.lane.b32.xlu0 %v981_v10, %s2138_s11 }
 0x47e   :  { %v1989_v13 = vpop.f32.mrf.mxu1 }
 0x480   :  { %v1057_v14 = vpop.f32.mrf.mxu0 }
 0x481   :  { %1446 = vrot.lane.b32.xlu1 %v1057_v14, %s2139_s16 }
 0x482   :  { %v1994_v16 = vpop.f32.mrf.mxu0 }
 0x484   :  { %v1209_v17 = vpop.f32.mrf.mxu0 }
 0x485   :  { %v1133_v18 = vpop.f32.mrf.mxu1 }
 0x486   :  { %1450 = vrot.lane.b32.xlu1 %v1133_v18, %s2140_s19  ;;  %v2004_v19 = vpop.f32.mrf.mxu0  ;;  %v1594_v18 = vsub.s32 4, %v2195_v7 }
 0x487   :  { %v1999_v22 = vpop.f32.mrf.mxu1  ;;  %v1600_v19 = vsub.s32 5, %v2195_v7 }
 0x488   :  { %v1361_v23 = vpop.f32.mrf.mxu0 }
 0x489   :  { %v1285_v24 = vpop.f32.mrf.mxu1 }
 0x48a   :  { %1459 = vrot.lane.b32.xlu0 %v1285_v24, %s2138_s11  ;;  %v2014_v25 = vpop.f32.mrf.mxu0 }
 0x48b   :  { %v2009_v26 = vpop.f32.mrf.mxu1  ;;  %v1601_v25 = vrot.slane %v2198_v9, %v1600_v19 }
 0x48d   :  { %v1437_v27 = vpop.f32.mrf.mxu1 }
 0x48e   :  { %1467 = vrot.lane.b32.xlu1 %v1437_v27, %s2140_s19  ;;  %1463 = vrot.lane.b32.xlu0 %v1361_v23, %s2139_s16 }
 0x48f   :  { %v2019_v28 = vpop.f32.mrf.mxu1 }
 0x4ef   :  { %v1443_v30 = vpop.permute.xlu0 %1442 }
 0x4f0   :  { %v1453_v31 = vsel %vm138_vm2, %v905_v4, %v1443_v30  ;;  %v1698_v30 = vld [vmem:[%s2443_s2 + $0x18] sm:$0xff] }
 0x4f3   :  { %v1447_v29 = vpop.permute.xlu1 %1446 }
 0x4f4   :  { %v1455_v32 = vsel %vm1454_vm3, %v1453_v31, %v1447_v29  ;;  %v1697_v31 = vld [vmem:[%s2443_s2 + $0x10] sm:$0xff] }
 0x4f8   :  { %v1451_v33 = vpop.permute.xlu1 %1450 }
 0x4f9   :  { %v1457_v34 = vsel %vm1456_vm4, %v1455_v32, %v1451_v33  ;;  %v1696_v32 = vld [vmem:[%s2443_s2 + $0x8] sm:$0xff]  ;;  %v1695_v33 = vld [vmem:[%s2443_s2] sm:$0xff] }
 0x4fa   :  { %2028 = vmatprep.mubr.msk.f32.mxu0 %vm40_vm0, %v1457_v34  ;;  %v1610_v34 = vsub.s32 2, %v2195_v7 }
 0x4fc   :  { %v1460_v35 = vpop.permute.xlu0 %1459 }
 0x4fd   :  { %v1470_v36 = vsel %vm138_vm2, %v1209_v17, %v1460_v35  ;;  %v1611_v35 = vrot.slane %v2198_v9, %v1610_v34 }
 0x500   :  { %v1468_v37 = vpop.permute.xlu1 %1467  ;;  %v1464_v38 = vpop.permute.xlu0 %1463 }
 0x501   :  { %v1471_v39 = vsel %vm1454_vm3, %v1470_v36, %v1464_v38 }
 0x502   :  { %v1472_v40 = vsel %vm1456_vm4, %v1471_v39, %v1468_v37 }
 0x503   :  { %2029 = vmatmul.mubr.msk.f32.vlgmr.msra.gmra.mxu0 %vm40_vm0, %v1472_v40 }
 0x504   :  { %2043 = vmatpush3.msra.mxu0 %v1702_v21 }
 0x505   :  { %2044 = vmatprep.subr.mxu0 %v1701_v45 }
 0x506   :  { %2045 = vmatpush3.msra.mxu0 %v1701_v45 }
 0x507   :  { %2046 = vmatprep.subr.mxu0 %v1700_v20 }
 0x508   :  { %2047 = vmatpush3.msra.mxu0 %v1700_v20 }
 0x509   :  { %2048 = vmatprep.subr.mxu0 %v1699_v46 }
 0x50a   :  { %2049 = vmatpush3.msra.mxu0 %v1699_v46 }
 0x50b   :  { %2050 = vmatprep.subr.mxu0 %v1698_v30 }
 0x50c   :  { %2051 = vmatpush3.msra.mxu0 %v1698_v30 }
 0x50d   :  { %2052 = vmatprep.subr.mxu0 %v1697_v31 }
 0x50e   :  { %2053 = vmatpush3.msra.mxu0 %v1697_v31 }
 0x50f   :  { %2054 = vmatprep.subr.mxu0 %v1696_v32 }
 0x510   :  { %2055 = vmatpush3.msra.mxu0 %v1696_v32 }
 0x511   :  { %2056 = vmatprep.subr.mxu0 %v1695_v33 }
 0x512   :  { %2057 = vmatpush3.msra.mxu0 %v1695_v33 }
 0x5c3   :  { %v2030_v49 = vpop.f32.mrf.mxu0 }
 0x5c4   :  { %v1559_v50 = vadd.f32 %v2030_v49, %v1480_v48 }
 0x5c5   :  { %v1553_v51 = vpop.f32.mrf.mxu0 }
 0x5c6   :  { %v1563_v52 = vadd.f32 %v1559_v50, %v2191_v5  ;;  %v1554_v53 = vadd.f32 %v1553_v51, %v1480_v48 }
 0x5c8   :  { %v1562_v54 = vadd.f32 %v1554_v53, %v2178_v2  ;;  %v1565_v55 = vsel %vm40_vm0, %v1563_v52, 0.0 }
 0x5ca   :  { %v1564_v56 = vsel %vm40_vm0, %v1562_v54, 0.0 }
 0x5cb   :  { %v1566_v57 = vadd.f32 %v1565_v55, %v1564_v56 }
 0x5cd   :  { %v1567_v58 = vrot.slane %v1566_v57, 4 }
 0x5cf   :  { %v1568_v59 = vadd.f32 %v1567_v58, %v1566_v57 }
 0x5d1   :  { %v1569_v60 = vrot.slane %v1568_v59, 2 }
 0x5d3   :  { %v1570_v61 = vadd.f32 %v1569_v60, %v1568_v59 }
 0x5d5   :  { %v1571_v62 = vrot.slane %v1570_v61, 1 }
 0x5d7   :  { %v1572_v63 = vadd.f32 %v1571_v62, %v1570_v61 }
 0x5d9   :  { %v1574_v0 = vmul.f32 0.0625, %v1572_v63 }
 0x5db   :  { %v1575_v1 = vsub.f32 %v1562_v54, %v1574_v0  ;;  %v1576_v3 = vsub.f32 %v1563_v52, %v1574_v0 }
 0x5dd   :  { %v1577_v4 = vmul.f32 %v1575_v1, %v1575_v1  ;;  %v1578_v6 = vmul.f32 %v1576_v3, %v1576_v3 }
 0x5df   :  { %v1579_v5 = vsel %vm40_vm0, %v1577_v4, 0.0  ;;  %v1580_v2 = vsel %vm40_vm0, %v1578_v6, 0.0 }
 0x5e0   :  { %v1581_v8 = vadd.f32 %v1580_v2, %v1579_v5 }
 0x5e2   :  { %v1582_v10 = vrot.slane %v1581_v8, 4 }
 0x5e4   :  { %v1583_v11 = vadd.f32 %v1582_v10, %v1581_v8 }
 0x5e6   :  { %v1584_v12 = vrot.slane %v1583_v11, 2 }
 0x5e8   :  { %v1585_v13 = vadd.f32 %v1584_v12, %v1583_v11  ;;  %v1820_v11 = vsub.s32 6, %v2195_v7  ;;  %v1826_v12 = vsub.s32 7, %v2195_v7 }
 0x5ea   :  { %v1586_v14 = vrot.slane %v1585_v13, 1 }
 0x5ec   :  { %v1587_v15 = vadd.f32 %v1586_v14, %v1585_v13 }
 0x5ee   :  { %v1588_v16 = vmul.f32 0.0625, %v1587_v15 }
 0x5f0   :  { %v1589_v17 = vadd.f32 1e-05, %v1588_v16  ;;  %v1827_v16 = vrot.slane %v2198_v9, %v1826_v12 }
 0x5f2   :  { %2104 = vrsqrt.f32 %v1589_v17 }
 0x5ff   :  { %v2105_v22 = vpop.eup %2104 }
 0x600   :  { %v1591_v23 = vmul.f32 %v2105_v22, %v2198_v9 }
 0x602   :  { %v1595_v24 = vrot.slane %v1591_v23, %v1594_v18 }
 0x604   :  { %v1596_v26 = vmul.f32 %v1595_v24, %v1575_v1  ;;  %v1597_v27 = vmul.f32 %v1595_v24, %v1576_v3 }
 0x606   :  { %v1602_v28 = vadd.f32 %v1601_v25, %v1596_v26  ;;  %v1603_v29 = vadd.f32 %v1601_v25, %v1597_v27 }
 0x608   :  { %2039 = vmatprep.mubr.msk.f32.mxu1 %vm40_vm0, %v1602_v28 }
 0x609   :  { %2040 = vmatmul.mubr.msk.f32.vlgmr.msra.gmra.mxu1 %vm40_vm0, %v1603_v29 }
 0x6c9   :  { %v2041_v36 = vpop.f32.mrf.mxu1 }
 0x6ca   :  { %v1690_v37 = vadd.f32 %v2041_v36, %v1611_v35 }
 0x6cb   :  { %v1684_v38 = vpop.f32.mrf.mxu1 }
 0x6cc   :  { %v1685_v39 = vadd.f32 %v1684_v38, %v1611_v35  ;;  %v1694_v41 = vmax.f32 %v1690_v37, 0.0 }
 0x6ce   :  { %v1693_v40 = vmax.f32 %v1685_v39, 0.0 }
 0x6d0   :  { %2058 = vmatprep.mubr.msk.f32.mxu0 %vm1707_vm5, %v1693_v40 }
 0x6d1   :  { %2059 = vmatmul.mubr.msk.f32.vlgmr.msra.gmra.mxu0 %vm1707_vm5, %v1694_v41 }
 0x791   :  { %v2060_v44 = vpop.f32.mrf.mxu0 }
 0x792   :  { %v1786_v21 = vadd.f32 %v2060_v44, %v1706_v43 }
 0x793   :  { %v1780_v45 = vpop.f32.mrf.mxu0 }
 0x794   :  { %v1790_v20 = vadd.f32 %v1786_v21, %v1603_v29  ;;  %v1781_v46 = vadd.f32 %v1780_v45, %v1706_v43 }
 0x796   :  { %v1789_v47 = vadd.f32 %v1781_v46, %v1602_v28  ;;  %v1792_v48 = vsel %vm40_vm0, %v1790_v20, 0.0 }
 0x798   :  { %v1791_v49 = vsel %vm40_vm0, %v1789_v47, 0.0 }
 0x799   :  { %v1793_v50 = vadd.f32 %v1792_v48, %v1791_v49 }
 0x79b   :  { %v1794_v51 = vrot.slane %v1793_v50, 4 }
 0x79d   :  { %v1795_v52 = vadd.f32 %v1794_v51, %v1793_v50 }
 0x79f   :  { %v1796_v53 = vrot.slane %v1795_v52, 2 }
 0x7a1   :  { %v1797_v54 = vadd.f32 %v1796_v53, %v1795_v52 }
 0x7a3   :  { %v1798_v55 = vrot.slane %v1797_v54, 1 }
 0x7a5   :  { %v1799_v56 = vadd.f32 %v1798_v55, %v1797_v54 }
 0x7a7   :  { %v1800_v57 = vmul.f32 0.0625, %v1799_v56 }
 0x7a9   :  { %v1801_v58 = vsub.f32 %v1789_v47, %v1800_v57  ;;  %v1802_v59 = vsub.f32 %v1790_v20, %v1800_v57 }
 0x7ab   :  { %v1803_v60 = vmul.f32 %v1801_v58, %v1801_v58  ;;  %v1804_v61 = vmul.f32 %v1802_v59, %v1802_v59 }
 0x7ad   :  { %v1805_v62 = vsel %vm40_vm0, %v1803_v60, 0.0  ;;  %v1806_v63 = vsel %vm40_vm0, %v1804_v61, 0.0 }
 0x7ae   :  { %v1807_v0 = vadd.f32 %v1806_v63, %v1805_v62 }
 0x7b0   :  { %v1808_v1 = vrot.slane %v1807_v0, 4 }
 0x7b2   :  { %v1809_v3 = vadd.f32 %v1808_v1, %v1807_v0 }
 0x7b4   :  { %v1810_v4 = vrot.slane %v1809_v3, 2 }
 0x7b6   :  { %v1811_v6 = vadd.f32 %v1810_v4, %v1809_v3 }
 0x7b8   :  { %v1812_v5 = vrot.slane %v1811_v6, 1 }
 0x7ba   :  { %v1813_v2 = vadd.f32 %v1812_v5, %v1811_v6 }
 0x7bc   :  { %v1814_v8 = vmul.f32 0.0625, %v1813_v2 }
 0x7be   :  { %v1815_v10 = vadd.f32 1e-05, %v1814_v8 }
 0x7c0   :  { %2106 = vrsqrt.f32 %v1815_v10 }
 0x7cd   :  { %v2107_v13 = vpop.eup %2106 }
 0x7ce   :  { %v1817_v14 = vmul.f32 %v2107_v13, %v2198_v9 }
 0x7d0   :  { %v1821_v15 = vrot.slane %v1817_v14, %v1820_v11 }
 0x7d2   :  { %v1822_v17 = vmul.f32 %v1821_v15, %v1801_v58  ;;  %v1823_v18 = vmul.f32 %v1821_v15, %v1802_v59 }
 0x7d4   :  { %v1828_v19 = vadd.f32 %v1827_v16, %v1822_v17  ;;  %v1829_v22 = vadd.f32 %v1827_v16, %v1823_v18 }
 0x7d6   :  { %1830 = vst.msk [vmem:[%s2445_s4] sm:$0xff] %vm40_vm0, %v1828_v19  ;;  %1831 = vst.msk [vmem:[%s2445_s4 + $0x8] sm:$0xff] %vm40_vm0, %v1829_v22 }
 0x7d7   :  { %1836 = vsyncpa [#allocation3], 1 }

</bundles_post_ra>
